<compile_context>
chip_gen: v7x
topology: tpu7x:2x2x1
jax: 0.10.0
libtpu: 0.0.40
codegen_flags: <defaults>
</compile_context>

<pallas_src>
import jax
import jax.numpy as jnp
from jax.experimental import pallas as pl
from jax.experimental.pallas import tpu as pltpu

SIGMA = 0.5  # module default


def _round_up(x, m):
    return ((x + m - 1) // m) * m


def _pick_tile(dim_p, t_max, unit):
    """Largest multiple of `unit` that is <= min(t_max, dim_p) and divides dim_p."""
    t = max(unit, min(t_max, dim_p))
    t = (t // unit) * unit
    while dim_p % t:
        t -= unit
    return t


def noisy_linear_kernel(x_ref, wmu_ref, wsig_ref, eps_in_ref, eps_out_ref,
                        bias_ref, out_ref):
    # x_ref:       (tm, tk)  bf16          wmu_ref / wsig_ref: (tk, tn) bf16
    # eps_in_ref:  (1, in_p) f32 resident  eps_out_ref / bias_ref: (1, out_p) f32 resident
    # out_ref:     (tm, tn)  f32 — VMEM-resident across K, doubles as the accumulator.
    j = pl.program_id(1)
    k = pl.program_id(2)
    tk = x_ref.shape[1]
    tn = out_ref.shape[1]

    n_off = pl.multiple_of(j * tn, 128)
    eps_out = eps_out_ref[:, pl.ds(n_off, tn)]                # (1, tn) f32

    @pl.when(k == 0)
    def _():
        bias = bias_ref[:, pl.ds(n_off, tn)]                  # (1, tn) f32
        out_ref[...] = jnp.broadcast_to(bias, out_ref.shape)  # init accumulator with bias

    k_off = pl.multiple_of(k * tk, 128)
    eps_in = eps_in_ref[:, pl.ds(k_off, tk)]                  # (1, tk) f32

    x_bf = x_ref[...]                                         # bf16
    # f32 VPU multiply (v5e-safe), then back to the matmul operand dtype.
    xe_bf = (x_bf.astype(jnp.float32) * eps_in).astype(x_bf.dtype)

    # Two MXU matmuls, bf16 operands, f32 accumulation.
    mu_part = jnp.dot(x_bf, wmu_ref[...], preferred_element_type=jnp.float32)
    sig_part = jnp.dot(xe_bf, wsig_ref[...], preferred_element_type=jnp.float32)

    # Split updates: no full-tile (mu + sig*eps) temporary per K step.
    out_ref[...] += mu_part
    out_ref[...] += sig_part * eps_out


def prepare_noisy_linear(weight_mu, weight_sigma, bias_mu, bias_sigma,
                         weights_dtype=jnp.bfloat16):
    """One-time parameter re-layout (call once per parameter update, NOT per forward):
    transpose to (in, out), cast to the streaming dtype, zero-pad to 128 multiples.
    Also hoists the sigma abs-mean diagnostics (independent of x / noise)."""
    out_f, in_f = weight_mu.shape
    out_p = _round_up(out_f, 128)
    in_p = _round_up(in_f, 128)
    wmu_t = jnp.pad(weight_mu.T.astype(weights_dtype),
                    ((0, in_p - in_f), (0, out_p - out_f)))
    wsig_t = jnp.pad(weight_sigma.T.astype(weights_dtype),
                     ((0, in_p - in_f), (0, out_p - out_f)))
    return {
        "wmu_t": wmu_t,
        "wsig_t": wsig_t,
        "bias_mu": bias_mu.astype(jnp.float32),
        "bias_sigma": bias_sigma.astype(jnp.float32),
        "in_features": in_f,
        "out_features": out_f,
        "weights_dtype": weights_dtype,
        "weight_sigma_mean": jnp.mean(jnp.abs(weight_sigma)),
        "bias_sigma_mean": jnp.mean(jnp.abs(bias_sigma)),
    }


def noisy_linear_forward(x, params, eps_in, eps_out, *,
                         tm_max=256, tn_max=1024, tk_max=1024,
                         split_n_for_two_cores=True):
    """x: (B, in_features). `params` comes from prepare_noisy_linear().
       eps_in: (in_features,), eps_out: (out_features,)."""
    in_f = params["in_features"]
    out_f = params["out_features"]
    assert x.ndim == 2 and x.shape[1] == in_f, \
        f"Expected input shape (batch, {in_f}), got {x.shape}"
    B = x.shape[0]

    wmu_t = params["wmu_t"]
    wsig_t = params["wsig_t"]
    in_p, out_p = wmu_t.shape
    wdt = params["weights_dtype"]

    # Tiles: multiples of (8, 128) that divide the padded dims (no over-padding).
    b_p = _round_up(B, 8)
    tm = _pick_tile(b_p, tm_max, 8)
    tn = _pick_tile(out_p, tn_max, 128)
    tk = _pick_tile(in_p, tk_max, 128)

    # v7x: ensure the parallel (i,j) grid has >= 2 blocks so both TensorCores work.
    if split_n_for_two_cores and (b_p // tm) == 1 and (out_p // tn) == 1 and out_p >= 256:
        tn = _pick_tile(out_p, out_p // 2, 128)

    # Per-call prep is O(B*in + in + out) only: cast/pad x, fold bias with noise.
    xp = x.astype(wdt)
    if (b_p, in_p) != (B, in_f):
        xp = jnp.pad(xp, ((0, b_p - B), (0, in_p - in_f)))
    eff_bias = params["bias_mu"] + params["bias_sigma"] * eps_out.astype(jnp.float32)
    eff_bias_r = jnp.pad(eff_bias, (0, out_p - out_f)).reshape(1, out_p)
    eps_out_r = jnp.pad(eps_out.astype(jnp.float32), (0, out_p - out_f)).reshape(1, out_p)
    eps_in_r = jnp.pad(eps_in.astype(jnp.float32), (0, in_p - in_f)).reshape(1, in_p)

    grid = (b_p // tm, out_p // tn, in_p // tk)

    out_padded = pl.pallas_call(
        noisy_linear_kernel,
        out_shape=jax.ShapeDtypeStruct((b_p, out_p), jnp.float32),
        grid_spec=pltpu.PrefetchScalarGridSpec(
            num_scalar_prefetch=0,
            grid=grid,
            in_specs=[
                pl.BlockSpec((tm, tk), lambda i, j, k: (i, k)),    # x        bf16
                pl.BlockSpec((tk, tn), lambda i, j, k: (k, j)),    # Wmu^T    bf16
                pl.BlockSpec((tk, tn), lambda i, j, k: (k, j)),    # Wsig^T   bf16
                pl.BlockSpec((1, in_p), lambda i, j, k: (0, 0)),   # eps_in   f32, resident
                pl.BlockSpec((1, out_p), lambda i, j, k: (0, 0)),  # eps_out  f32, resident
                pl.BlockSpec((1, out_p), lambda i, j, k: (0, 0)),  # eff_bias f32, resident
            ],
            out_specs=pl.BlockSpec((tm, tn), lambda i, j, k: (i, j)),
        ),
        compiler_params=pltpu.CompilerParams(
            dimension_semantics=("parallel", "parallel", "arbitrary"),
            vmem_limit_bytes=48 * 1024 * 1024,  # max tiles ~12 MiB double-buffered; safe v5e..v7x
        ),
    )(xp, wmu_t, wsig_t, eps_in_r, eps_out_r, eff_bias_r)

    out = out_padded[:B, :out_f]
    stats = {
        "weight_sigma_mean": params["weight_sigma_mean"],
        "bias_sigma_mean": params["bias_sigma_mean"],
    }
    return out, stats


def init_params(key, in_features, out_features, sigma=SIGMA):
    """Deterministic parameter init mirroring NoisyLinear.reset_parameters()."""
    (k_w,) = jax.random.split(key, 1)
    bound = jnp.sqrt(6.0 / (in_features + out_features))   # xavier_uniform_ on (out, in)
    weight_mu = jax.random.uniform(
        k_w, (out_features, in_features), jnp.float32, minval=-bound, maxval=bound)
    weight_sigma = jnp.full((out_features, in_features),
                            sigma / jnp.sqrt(float(in_features)), jnp.float32)
    bias_mu = jnp.zeros((out_features,), jnp.float32)
    bias_sigma = jnp.full((out_features,),
                          sigma / jnp.sqrt(float(in_features)), jnp.float32)
    return weight_mu, weight_sigma, bias_mu, bias_sigma


def make_noise(key, in_features, out_features):
    """Deterministic equivalent of reset_noise(): f(x) = sign(x) * sqrt(|x|)."""
    k_in, k_out = jax.random.split(key)
    e_in = jax.random.normal(k_in, (in_features,), jnp.float32) / jnp.sqrt(float(in_features))
    e_out = jax.random.normal(k_out, (out_features,), jnp.float32) / jnp.sqrt(float(out_features))
    f = lambda e: jnp.sign(e) * jnp.sqrt(jnp.abs(e))
    return f(e_in), f(e_out)


if __name__ == "__main__":
    key = jax.random.PRNGKey(0)
    k_x, k_p, k_n = jax.random.split(key, 3)

    batch, in_features, out_features = 8, 32, 64
    x = jax.random.normal(k_x, (batch, in_features), jnp.float32)

    weight_mu, weight_sigma, bias_mu, bias_sigma = init_params(k_p, in_features, out_features)
    eps_in, eps_out = make_noise(k_n, in_features, out_features)

    # One-time canonical re-layout of the weights (hoisted out of the forward path).
    params = prepare_noisy_linear(weight_mu, weight_sigma, bias_mu, bias_sigma)

    out, stats = noisy_linear_forward(x, params, eps_in, eps_out)
    out = jax.block_until_ready(out)
    jax.block_until_ready(stats["weight_sigma_mean"])
    jax.block_until_ready(stats["bias_sigma_mean"])

    eff_bias = bias_mu + bias_sigma * eps_out

    # (a) Reference mirroring the kernel's bf16 operand rounding exactly.
    bf = lambda a: a.astype(jnp.bfloat16).astype(jnp.float32)
    x_bf = bf(x)
    ref_bf = (x_bf @ bf(weight_mu).T
              + (bf(x_bf * eps_in[None, :]) @ bf(weight_sigma).T) * eps_out[None, :]
              + eff_bias[None, :])
    assert jnp.allclose(out, ref_bf, atol=2e-3, rtol=2e-3), "mismatch vs bf16-aware reference"

    # (b) Module-level f32 reference (loose tolerance covers bf16 weight streaming).
    weight = weight_mu + weight_sigma * (eps_out[:, None] * eps_in[None, :])
    ref = x @ weight.T + eff_bias[None, :]
    assert jnp.allclose(out, ref, atol=5e-2, rtol=5e-2), "mismatch vs f32 module reference"

    assert jnp.allclose(stats["weight_sigma_mean"], jnp.mean(jnp.abs(weight_sigma)), atol=1e-6)
    assert jnp.allclose(stats["bias_sigma_mean"], jnp.mean(jnp.abs(bias_sigma)), atol=1e-6)

    print("KERNEL_OK")
</pallas_src>

<mosaic_0001>
module attributes {stable_mosaic.version = 11 : i64} {
  func.func @noisy_linear_kernel(%arg0: i32, %arg1: i32, %arg2: i32, %arg3: memref<8x128xbf16, #tpu.memory_space<vmem>>, %arg4: memref<128x128xbf16, #tpu.memory_space<vmem>>, %arg5: memref<128x128xbf16, #tpu.memory_space<vmem>>, %arg6: memref<1x128xf32, #tpu.memory_space<vmem>>, %arg7: memref<1x128xf32, #tpu.memory_space<vmem>>, %arg8: memref<1x128xf32, #tpu.memory_space<vmem>>, %arg9: memref<8x128xf32, #tpu.memory_space<vmem>>) attributes {dimension_semantics = [#tpu.dimension_semantics<parallel>, #tpu.dimension_semantics<parallel>, #tpu.dimension_semantics<arbitrary>], iteration_bounds = array<i64: 1, 1, 1>, scalar_prefetch = 0 : i64, scratch_operands = 0 : i64, tpu.core_type = #tpu.core_type<tc>, window_params = [{transform_indices = @transform_0, window_bounds = array<i64: 8, 128>}, {transform_indices = @transform_1, window_bounds = array<i64: 128, 128>}, {transform_indices = @transform_2, window_bounds = array<i64: 128, 128>}, {pipeline_mode = #tpu.pipeline_mode<synchronous>, transform_indices = @transform_3, window_bounds = array<i64: 1, 128>}, {pipeline_mode = #tpu.pipeline_mode<synchronous>, transform_indices = @transform_4, window_bounds = array<i64: 1, 128>}, {pipeline_mode = #tpu.pipeline_mode<synchronous>, transform_indices = @transform_5, window_bounds = array<i64: 1, 128>}, {transform_indices = @transform_6, window_bounds = array<i64: 8, 128>}]} {
    %c128_i32 = arith.constant 128 : i32
    %0 = arith.muli %arg1, %c128_i32 : i32
    %1 = tpu.assume_multiple %0, 128 : i32
    %c0 = arith.constant 0 : index
    %2 = arith.index_cast %1 : i32 to index
    %3 = vector.load %arg7[%c0, %2] : memref<1x128xf32, #tpu.memory_space<vmem>>, vector<1x128xf32>
    %c0_i32 = arith.constant 0 : i32
    %4 = arith.cmpi eq, %arg2, %c0_i32 : i32
    %5 = arith.extui %4 : i1 to i32
    %c0_i32_0 = arith.constant 0 : i32
    %6 = arith.cmpi ne, %5, %c0_i32_0 : i32
    scf.if %6 {
      %c0_18 = arith.constant 0 : index
      %28 = arith.index_cast %1 : i32 to index
      %29 = vector.load %arg8[%c0_18, %28] : memref<1x128xf32, #tpu.memory_space<vmem>>, vector<1x128xf32>
      %30 = vector.shape_cast %29 : vector<1x128xf32> to vector<1x128xf32>
      %31 = vector.broadcast %30 : vector<1x128xf32> to vector<8x128xf32>
      %c0_19 = arith.constant 0 : index
      %c0_20 = arith.constant 0 : index
      %32 = vector.load %arg9[%c0_19, %c0_20] : memref<8x128xf32, #tpu.memory_space<vmem>>, vector<8x128xf32>
      tpu.vector_store %arg9[%c0_19, %c0_20], %31 {strides = array<i32>} : memref<8x128xf32, #tpu.memory_space<vmem>>, vector<8x128xf32>,
    } else {
    }
    %c128_i32_1 = arith.constant 128 : i32
    %7 = arith.muli %arg2, %c128_i32_1 : i32
    %8 = tpu.assume_multiple %7, 128 : i32
    %c0_2 = arith.constant 0 : index
    %9 = arith.index_cast %8 : i32 to index
    %10 = vector.load %arg6[%c0_2, %9] : memref<1x128xf32, #tpu.memory_space<vmem>>, vector<1x128xf32>
    %c0_3 = arith.constant 0 : index
    %c0_4 = arith.constant 0 : index
    %11 = vector.load %arg3[%c0_3, %c0_4] : memref<8x128xbf16, #tpu.memory_space<vmem>>, vector<8x128xbf16>
    %12 = arith.extf %11 : vector<8x128xbf16> to vector<8x128xf32>
    %13 = vector.broadcast %10 : vector<1x128xf32> to vector<8x128xf32>
    %14 = arith.mulf %12, %13 : vector<8x128xf32>
    %15 = arith.truncf %14 : vector<8x128xf32> to vector<8x128xbf16>
    %c0_5 = arith.constant 0 : index
    %c0_6 = arith.constant 0 : index
    %16 = vector.load %arg4[%c0_5, %c0_6] : memref<128x128xbf16, #tpu.memory_space<vmem>>, vector<128x128xbf16>
    %cst = arith.constant dense<0.000000e+00> : vector<8x128xf32>
    %17 = tpu.matmul %11, %16, %cst {dimension_numbers = #tpu.dot_dimension_numbers<[1], [0], [0], [1], [0, 0, 1, 1], [], []>} : vector<8x128xbf16>, vector<128x128xbf16>, vector<8x128xf32> -> vector<8x128xf32>
    %c0_7 = arith.constant 0 : index
    %c0_8 = arith.constant 0 : index
    %18 = vector.load %arg5[%c0_7, %c0_8] : memref<128x128xbf16, #tpu.memory_space<vmem>>, vector<128x128xbf16>
    %cst_9 = arith.constant dense<0.000000e+00> : vector<8x128xf32>
    %19 = tpu.matmul %15, %18, %cst_9 {dimension_numbers = #tpu.dot_dimension_numbers<[1], [0], [0], [1], [0, 0, 1, 1], [], []>} : vector<8x128xbf16>, vector<128x128xbf16>, vector<8x128xf32> -> vector<8x128xf32>
    %c0_10 = arith.constant 0 : index
    %c0_11 = arith.constant 0 : index
    %20 = vector.load %arg9[%c0_10, %c0_11] : memref<8x128xf32, #tpu.memory_space<vmem>>, vector<8x128xf32>
    %21 = arith.addf %20, %17 : vector<8x128xf32>
    %c0_12 = arith.constant 0 : index
    %c0_13 = arith.constant 0 : index
    %22 = vector.load %arg9[%c0_12, %c0_13] : memref<8x128xf32, #tpu.memory_space<vmem>>, vector<8x128xf32>
    tpu.vector_store %arg9[%c0_12, %c0_13], %21 {strides = array<i32>} : memref<8x128xf32, #tpu.memory_space<vmem>>, vector<8x128xf32>,
    %c0_14 = arith.constant 0 : index
    %c0_15 = arith.constant 0 : index
    %23 = vector.load %arg9[%c0_14, %c0_15] : memref<8x128xf32, #tpu.memory_space<vmem>>, vector<8x128xf32>
    %24 = vector.broadcast %3 : vector<1x128xf32> to vector<8x128xf32>
    %25 = arith.mulf %19, %24 : vector<8x128xf32>
    %26 = arith.addf %23, %25 : vector<8x128xf32>
    %c0_16 = arith.constant 0 : index
    %c0_17 = arith.constant 0 : index
    %27 = vector.load %arg9[%c0_16, %c0_17] : memref<8x128xf32, #tpu.memory_space<vmem>>, vector<8x128xf32>
    tpu.vector_store %arg9[%c0_16, %c0_17], %26 {strides = array<i32>} : memref<8x128xf32, #tpu.memory_space<vmem>>, vector<8x128xf32>,
    return
  }
  func.func @transform_0(%arg0: i32, %arg1: i32, %arg2: i32) -> (i32, i32) {
    %c0_i32 = arith.constant 0 : i32
    return %arg0, %arg2 : i32, i32
  }
  func.func @transform_1(%arg0: i32, %arg1: i32, %arg2: i32) -> (i32, i32) {
    %c0_i32 = arith.constant 0 : i32
    return %arg2, %arg1 : i32, i32
  }
  func.func @transform_2(%arg0: i32, %arg1: i32, %arg2: i32) -> (i32, i32) {
    %c0_i32 = arith.constant 0 : i32
    return %arg2, %arg1 : i32, i32
  }
  func.func @transform_3(%arg0: i32, %arg1: i32, %arg2: i32) -> (i32, i32) {
    %c0_i32 = arith.constant 0 : i32
    %c0_i32_0 = arith.constant 0 : i32
    %c0_i32_1 = arith.constant 0 : i32
    return %c0_i32, %c0_i32_0 : i32, i32
  }
  func.func @transform_4(%arg0: i32, %arg1: i32, %arg2: i32) -> (i32, i32) {
    %c0_i32 = arith.constant 0 : i32
    %c0_i32_0 = arith.constant 0 : i32
    %c0_i32_1 = arith.constant 0 : i32
    return %c0_i32, %c0_i32_0 : i32, i32
  }
  func.func @transform_5(%arg0: i32, %arg1: i32, %arg2: i32) -> (i32, i32) {
    %c0_i32 = arith.constant 0 : i32
    %c0_i32_0 = arith.constant 0 : i32
    %c0_i32_1 = arith.constant 0 : i32
    return %c0_i32, %c0_i32_0 : i32, i32
  }
  func.func @transform_6(%arg0: i32, %arg1: i32, %arg2: i32) -> (i32, i32) {
    %c0_i32 = arith.constant 0 : i32
    return %arg0, %arg1 : i32, i32
  }
}

</mosaic_0001>

<bundles_post_ra>
// kernel: tpu_custom_call.1
= control target key start
LH: loop header
LB: loop body
LE: loop exit
PB: predicated region body
PF: predicated region fallthrough
CT: control target
= control target key end

     0   :  { %11 = vsyncpa [#allocation3], 0  ;;  %s638_s0 = inlined_call_operand.hbm [shape: bf16[8,128], index: 0, kind: input, shape index: {}]   ;;  %s639_s1 = inlined_call_operand.hbm [shape: bf16[128,128], index: 1, kind: input, shape index: {}]   ;;  %s640_s2 = inlined_call_operand.hbm [shape: bf16[128,128], index: 2, kind: input, shape index: {}]   ;;  %s641_s3 = inlined_call_operand.vmem [shape: f32[1,128], index: 3, kind: input, shape index: {}]   ;;  %s642_s4 = inlined_call_operand.vmem [shape: f32[1,128], index: 4, kind: input, shape index: {}]   ;;  %s643_s5 = inlined_call_operand.vmem [shape: f32[1,128], index: 5, kind: input, shape index: {}]   ;;  %s644_s6 = inlined_call_operand.hbm [shape: f32[8,128], index: 6, kind: output, shape index: {}]  }
   0x1   :  { %12 = vsyncpa [#allocation6], 0 }
   0x2   :  { %13 = vsyncpa [#allocation4], 0  ;;  %s532_s21 = smov [#allocation5]   ;;  %s438_s25 = scalar_lea.hbm %s639_s1, 1024 }
   0x3   :  { %s29_s22 = sshll.u32 %s532_s21, 4  ;;  %p439_p0 = scmp.ne.s32.totalorder %s639_s1, %s438_s25  ;;  %s30_s22 = int_to_ptr.vmem [resolvable:$true] %s29_s22 }
   0x4   :  { %p442_p1 = scmp.lt.u32.totalorder %s438_s25, %s639_s1 }
   0x6   :  { %p444_p2 = pnand %p442_p1, %p439_p0 }
   0x8   :  { %447 = shalt.err (!%p444_p2)
}
   0x9   :  { %s448_s30 = scalar_lea.vmem %s30_s22, 1024  ;;  %p453_p4 = scmp.lt.s32.totalorder %s30_s22, %s30_s22 }
   0xa   :  { %p449_p3 = scmp.ne.s32.totalorder %s30_s22, %s448_s30  ;;  %p454_p5 = scmp.lt.s32.totalorder %s448_s30, %s448_s30 }
   0xc   :  { %p455_p6 = por %p454_p5, %p453_p4 }
   0xe   :  { %p456_p7 = pnand %p455_p6, %p449_p3 }
  0x10   :  { %459 = shalt.err (!%p456_p7)
}
  0x11   :  { %s533_s7 = smov 64   ;;  %s534_s8 = smov 4  }
  0x12   :  { %35 = dma.hbm_to_vmem [thread:$0]  %s639_s1, 1024, %s30_s22, [#allocation6], %s533_s7, %s533_s7, %s534_s8  }
  0x13   :  { %s535_s11 = smov [#allocation2]   ;;  %s536_s13 = smov [#allocation7]  }
  0x14   :  { %s20_s12 = sshll.u32 %s535_s11, 4  ;;  %s41_s14 = sshll.u32 %s536_s13, 4  ;;  %s21_s12 = int_to_ptr.vmem [resolvable:$true] %s20_s12  ;;  %s42_s14 = int_to_ptr.vmem [resolvable:$true] %s41_s14 }
  0x15   :  { %s460_s17 = scalar_lea.hbm %s638_s0, 64 }
  0x16   :  { %p461_p8 = scmp.ne.s32.totalorder %s638_s0, %s460_s17  ;;  %p464_p9 = scmp.lt.u32.totalorder %s460_s17, %s638_s0 }
  0x18   :  { %p466_p10 = pnand %p464_p9, %p461_p8 }
  0x1a   :  { %469 = shalt.err (!%p466_p10)
}
  0x1b   :  { %s470_s1 = scalar_lea.vmem %s21_s12, 64  ;;  %p475_p12 = scmp.lt.s32.totalorder %s21_s12, %s21_s12 }
  0x1c   :  { %p471_p11 = scmp.ne.s32.totalorder %s21_s12, %s470_s1  ;;  %p476_p13 = scmp.lt.s32.totalorder %s470_s1, %s470_s1 }
  0x1e   :  { %p477_p0 = por %p476_p13, %p475_p12 }
  0x20   :  { %p478_p1 = pnand %p477_p0, %p471_p11 }
  0x22   :  { %481 = shalt.err (!%p478_p1)
}
  0x23   :  { %23 = dma.hbm_to_vmem [thread:$0]  %s638_s0, 64, %s21_s12, [#allocation3]  }
  0x24   :  { %s482_s26 = scalar_lea.hbm %s640_s2, 1024 }
  0x25   :  { %p483_p2 = scmp.ne.s32.totalorder %s640_s2, %s482_s26  ;;  %p486_p3 = scmp.lt.u32.totalorder %s482_s26, %s640_s2 }
  0x27   :  { %p488_p4 = pnand %p486_p3, %p483_p2 }
  0x29   :  { %491 = shalt.err (!%p488_p4)
}
  0x2a   :  { %s492_s9 = scalar_lea.vmem %s42_s14, 1024  ;;  %p497_p6 = scmp.lt.s32.totalorder %s42_s14, %s42_s14 }
  0x2b   :  { %p493_p5 = scmp.ne.s32.totalorder %s42_s14, %s492_s9  ;;  %p498_p7 = scmp.lt.s32.totalorder %s492_s9, %s492_s9 }
  0x2d   :  { %p499_p8 = por %p498_p7, %p497_p6 }
  0x2f   :  { %p500_p9 = pnand %p499_p8, %p493_p5 }
  0x31   :  { %503 = shalt.err (!%p500_p9)
}
  0x32   :  { %47 = dma.hbm_to_vmem [thread:$0]  %s640_s2, 1024, %s42_s14, [#allocation6], %s533_s7, %s533_s7, %s534_s8  }
  0x33   :  { %526 = dma.done.wait [#allocation3], 64  }
  0x34   :  { %527 = vsyncadd [#allocation3], 4294967232 }
  0x35   :  { %528 = dma.done.wait [#allocation6], 2048  }
  0x36   :  { %529 = vsyncadd [#allocation6], 4294965248  ;;  %v537_v0 = vmov 0.0   ;;  %vm538_vm0 = vmmov 0   ;;  %v422_v1 = vld [vmem:[#allocation5] sm:$0xff]   ;;  %v423_v2 = vld [vmem:[#allocation5 + $0x8] sm:$0xff]  }
  0x37   :  { %374 = vmatprep.subr.bf16.mxu0 %v537_v0  ;;  %394 = vmatprep.subr.bf16.mxu1 %v537_v0  ;;  %v424_v3 = vld [vmem:[#allocation7] sm:$0xff]   ;;  %v426_v4 = vld [vmem:[#allocation7 + $0x8] sm:$0xff]   ;;  %v425_v5 = vld [vmem:[#allocation5 + $0x10] sm:$0xff]   ;;  %s539_s13 = smov [#allocation8]  }
  0x38   :  { %390 = vmatprep.mubr.msk.bf16.mxu0 %vm538_vm0, %v537_v0  ;;  %410 = vmatprep.mubr.msk.bf16.mxu1 %vm538_vm0, %v537_v0  ;;  %v428_v6 = vld [vmem:[#allocation7 + $0x10] sm:$0xff]   ;;  %v427_v7 = vld [vmem:[#allocation5 + $0x18] sm:$0xff]   ;;  %v429_v9 = vld [vmem:[#allocation5 + $0x20] sm:$0xff]   ;;  %s324_s14 = sshll.u32 %s539_s13, 4  ;;  %s325_s14 = int_to_ptr.vmem [resolvable:$true] %s324_s14 }
  0x39   :  { %375 = vmatpush3.bf16.msra.mxu0 %v422_v1  ;;  %395 = vmatpush3.bf16.msra.mxu1 %v424_v3  ;;  %v430_v8 = vld [vmem:[#allocation7 + $0x18] sm:$0xff]   ;;  %v432_v10 = vld [vmem:[#allocation7 + $0x20] sm:$0xff]   ;;  %v431_v11 = vld [vmem:[#allocation5 + $0x28] sm:$0xff]   ;;  %p509_p11 = scmp.lt.s32.totalorder %s325_s14, %s325_s14 }
  0x3a   :  { %376 = vmatprep.subr.bf16.mxu0 %v537_v0  ;;  %396 = vmatprep.subr.bf16.mxu1 %v537_v0  ;;  %v434_v12 = vld [vmem:[#allocation7 + $0x28] sm:$0xff]   ;;  %v87_v13 = vld [vmem:[#allocation2] sm:$0xf]  ;;  %v433_v14 = vld [vmem:[#allocation5 + $0x30] sm:$0xff]  }
  0x3b   :  { %v88_v15 = vunpack.c.l.bf16 %v87_v13  ;;  %v436_v16 = vld [vmem:[#allocation7 + $0x30] sm:$0xff]   ;;  %v338_v17 = vld [vmem:[%s641_s3] ss:$0 sm:$0xff] }
  0x3c   :  { %v435_v18 = vld [vmem:[#allocation5 + $0x38] sm:$0xff]  }
  0x3d   :  { %377 = vmatpush3.bf16.msra.mxu0 %v423_v2  ;;  %397 = vmatpush3.bf16.msra.mxu1 %v426_v4  ;;  %v95_v19 = vmul.f32 %v338_v17, %v88_v15  ;;  %v437_v20 = vld [vmem:[#allocation7 + $0x38] sm:$0xff]  }
  0x3e   :  { %378 = vmatprep.subr.bf16.mxu0 %v537_v0  ;;  %398 = vmatprep.subr.bf16.mxu1 %v537_v0  ;;  %v337_v22 = vld [vmem:[%s643_s5] ss:$0 sm:$0xff]  ;;  %s504_s5 = scalar_lea.vmem %s325_s14, 128 }
  0x3f   :  { %v96_v21 = vpack.c.bf16 %v95_v19, %v95_v19  ;;  %v355_v24 = vld [vmem:[%s642_s4] ss:$0 sm:$0xff]  ;;  %p505_p10 = scmp.ne.s32.totalorder %s325_s14, %s504_s5  ;;  %p510_p12 = scmp.lt.s32.totalorder %s504_s5, %s504_s5 }
  0x41   :  { %379 = vmatpush3.bf16.msra.mxu0 %v425_v5  ;;  %399 = vmatpush3.bf16.msra.mxu1 %v428_v6  ;;  %p511_p13 = por %p510_p12, %p509_p11 }
  0x42   :  { %380 = vmatprep.subr.bf16.mxu0 %v537_v0  ;;  %400 = vmatprep.subr.bf16.mxu1 %v537_v0 }
  0x43   :  { %p512_p0 = pnand %p511_p13, %p505_p10 }
  0x45   :  { %381 = vmatpush3.bf16.msra.mxu0 %v427_v7  ;;  %401 = vmatpush3.bf16.msra.mxu1 %v430_v8 }
  0x46   :  { %382 = vmatprep.subr.bf16.mxu0 %v537_v0  ;;  %402 = vmatprep.subr.bf16.mxu1 %v537_v0 }
  0x49   :  { %383 = vmatpush3.bf16.msra.mxu0 %v429_v9  ;;  %403 = vmatpush3.bf16.msra.mxu1 %v432_v10 }
  0x4a   :  { %384 = vmatprep.subr.bf16.mxu0 %v537_v0  ;;  %404 = vmatprep.subr.bf16.mxu1 %v537_v0 }
  0x4d   :  { %385 = vmatpush3.bf16.msra.mxu0 %v431_v11  ;;  %405 = vmatpush3.bf16.msra.mxu1 %v434_v12 }
  0x4e   :  { %386 = vmatprep.subr.bf16.mxu0 %v537_v0  ;;  %406 = vmatprep.subr.bf16.mxu1 %v537_v0 }
  0x51   :  { %387 = vmatpush3.bf16.msra.mxu0 %v433_v14  ;;  %407 = vmatpush3.bf16.msra.mxu1 %v436_v16 }
  0x52   :  { %388 = vmatprep.subr.bf16.mxu0 %v537_v0  ;;  %408 = vmatprep.subr.bf16.mxu1 %v537_v0 }
  0x55   :  { %389 = vmatpush3.bf16.msra.mxu0 %v435_v18  ;;  %409 = vmatpush3.bf16.msra.mxu1 %v437_v20 }
  0x58   :  { %391 = vmatmul.mubr.bf16.vlgmr.msra.gmra.mrb[0].mxu0 %v87_v13  ;;  %411 = vmatmul.mubr.bf16.vlgmr.msra.gmra.mrb[0].mxu1 %v96_v21 }
 0x12b   :  { %v195_v23 = vpop.f32.mrb[0].mxu0  ;;  %v299_v28 = vpop.f32.mrb[0].mxu1 }
 0x12c   :  { %v306_v25 = vadd.f32 %v337_v22, %v195_v23  ;;  %v392_v26 = vpop.f32.mrb[1].mxu0  ;;  %v315_v30 = vmul.f32 %v355_v24, %v299_v28  ;;  %v412_v31 = vpop.f32.mrb[1].mxu1 }
 0x12d   :  { %v198_v27 = vpop.f32.mrb[2].mxu0  ;;  %v302_v32 = vpop.f32.mrb[2].mxu1 }
 0x12e   :  { %v393_v29 = vpop.f32.mrb[3].mxu0  ;;  %v316_v33 = vadd.f32 %v315_v30, %v306_v25  ;;  %v413_v34 = vpop.f32.mrb[3].mxu1 }
 0x130   :  { %317 = vst [vmem:[#allocation8] sm:$0xff] %v316_v33 }
 0x131   :  { %515 = shalt.err (!%p512_p0)
}
 0x132   :  { %s516_s16 = scalar_lea.hbm %s644_s6, 128 }
 0x133   :  { %p517_p1 = scmp.ne.s32.totalorder %s644_s6, %s516_s16  ;;  %p520_p2 = scmp.lt.u32.totalorder %s516_s16, %s644_s6 }
 0x135   :  { %p522_p3 = pnand %p520_p2, %p517_p1 }
 0x137   :  { %525 = shalt.err (!%p522_p3)
}
 0x138   :  { %327 = dma.vmem_to_hbm [thread:$0]  %s325_s14, 128, %s644_s6, [#allocation4]  }
 0x139   :  { %530 = dma.done.wait [#allocation4], 128  }
 0x13a   :  { %531 = vsyncadd [#allocation4], 4294967168 }
 0x13b   :  { %331 = vsyncpa [#allocation3], 1 }
 0x13c   :  { %332 = vsyncpa [#allocation6], 1 }
 0x13d   :  { %333 = vsyncpa [#allocation4], 1 }

</bundles_post_ra>
